<compile_context>
chip_gen: v7x
topology: tpu7x:2x2x1
jax: 0.10.0
libtpu: 0.0.40
codegen_flags: <defaults>
</compile_context>

<pallas_src>
import functools
import numpy as np
import jax
import jax.numpy as jnp
from jax.experimental import pallas as pl
from jax.experimental.pallas import tpu as pltpu

LEAK = 0.1
BN_EPS = 1e-5
OUT_PAD = 128          # final layer padded to a lane-dense 128-wide output
DEFAULT_TILE_E = 512   # edge rows per grid step (multiple of 128)


def _round_up(a, b):
    return (a + b - 1) // b * b


# ---------------------------------------------------------------------------
# Kernel 1 ("prep"): node BatchNorm + global edge-feature affine.
#   x_n      = batchnorm(x)                      (done once, at grid step 0)
#   e_affine = [scale; shift] with bn(e) == e * scale + shift
# ---------------------------------------------------------------------------
def _prep_kernel(x_ref, e_ref, gx_ref, bx_ref, ge_ref, be_ref,
                 xn_ref, eaff_ref, acc_ref, *, n_edges):
    i = pl.program_id(0)

    @pl.when(i == 0)
    def _():
        x = x_ref[...]
        m = jnp.mean(x, axis=0, keepdims=True)
        v = jnp.mean((x - m) ** 2, axis=0, keepdims=True)   # biased variance
        xn_ref[...] = (x - m) * jax.lax.rsqrt(v + BN_EPS) * gx_ref[...] + bx_ref[...]
        acc_ref[...] = jnp.zeros_like(acc_ref)

    # Zero-padded rows contribute nothing to sum / sumsq.
    e = e_ref[...]
    acc_ref[0:1, :] = acc_ref[0:1, :] + jnp.sum(e, axis=0, keepdims=True)
    acc_ref[1:2, :] = acc_ref[1:2, :] + jnp.sum(e * e, axis=0, keepdims=True)

    @pl.when(i == pl.num_programs(0) - 1)
    def _():
        inv_n = jnp.float32(1.0 / n_edges)        # true edge count, not padded
        mean = acc_ref[0:1, :] * inv_n
        var = acc_ref[1:2, :] * inv_n - mean * mean
        scale = ge_ref[...] * jax.lax.rsqrt(var + BN_EPS)
        eaff_ref[0:1, :] = scale
        eaff_ref[1:2, :] = be_ref[...] - mean * scale


def prep_bn(x, e_pad, n_edges, gx, bx, ge, be, tile_e):
    n_nodes, n_nf = x.shape
    e_rows, n_ef = e_pad.shape
    const = lambda i: (0, 0)
    return pl.pallas_call(
        functools.partial(_prep_kernel, n_edges=n_edges),
        grid=(e_rows // tile_e,),
        in_specs=[
            pl.BlockSpec((n_nodes, n_nf), const),          # x (full table)
            pl.BlockSpec((tile_e, n_ef), lambda i: (i, 0)),  # e (tiled)
            pl.BlockSpec((1, n_nf), const),
            pl.BlockSpec((1, n_nf), const),
            pl.BlockSpec((1, n_ef), const),
            pl.BlockSpec((1, n_ef), const),
        ],
        out_specs=[
            pl.BlockSpec((n_nodes, n_nf), const),
            pl.BlockSpec((2, n_ef), const),
        ],
        out_shape=[
            jax.ShapeDtypeStruct((n_nodes, n_nf), jnp.float32),
            jax.ShapeDtypeStruct((2, n_ef), jnp.float32),
        ],
        scratch_shapes=[pltpu.VMEM((2, n_ef), jnp.float32)],
        compiler_params=pltpu.CompilerParams(dimension_semantics=("arbitrary",)),
    )(x, e_pad, gx.reshape(1, -1), bx.reshape(1, -1),
      ge.reshape(1, -1), be.reshape(1, -1))


# ---------------------------------------------------------------------------
# Kernel 2 (fused): per-edge-tile BN apply + node gather + 6-layer MLP
# ---------------------------------------------------------------------------
def _edge_kernel(xn_ref, eaff_ref, e_ref, idx_ref,
                 w1s, w1d, w1e, b1, w2, b2, w3, b3, w4, b4, w5, b5, w6, b6,
                 out_ref):
    f32 = jnp.float32

    # Edge-feature BatchNorm from precomputed global affine.
    e = e_ref[...] * eaff_ref[0:1, :] + eaff_ref[1:2, :]

    # Gather src/dst rows from the VMEM-resident normalized node table via
    # one-hot matmul on the MXU (robust lowering, no HBM round trip).
    xn = xn_ref[...]
    n_nodes = xn.shape[0]
    idx = idx_ref[...]
    node_ids = jax.lax.broadcasted_iota(jnp.int32, (idx.shape[0], n_nodes), 1)
    src = jnp.dot((node_ids == idx[:, 0:1]).astype(f32), xn,
                  preferred_element_type=f32)
    dst = jnp.dot((node_ids == idx[:, 1:2]).astype(f32), xn,
                  preferred_element_type=f32)

    # First Linear with W1 split into row blocks (no lane concatenation).
    h = (jnp.dot(src, w1s[...], preferred_element_type=f32)
         + jnp.dot(dst, w1d[...], preferred_element_type=f32)
         + jnp.dot(e, w1e[...], preferred_element_type=f32)
         + b1[...])
    h = jnp.where(h > 0, h, LEAK * h)

    def lin_lrelu(h, w, b):
        h = jnp.dot(h, w[...], preferred_element_type=f32) + b[...]
        return jnp.where(h > 0, h, LEAK * h)

    h = lin_lrelu(h, w2, b2)
    h = lin_lrelu(h, w3, b3)
    h = lin_lrelu(h, w4, b4)
    h = lin_lrelu(h, w5, b5)
    # Final Linear, zero-padded to 128 output lanes -> lane-dense store.
    out_ref[...] = jnp.dot(h, w6[...], preferred_element_type=f32) + b6[...]


def edge_pred_mlp(x_n, e_aff, e_pad, idx_pad, mlp_params, tile_e):
    n_nodes, n_nf = x_n.shape
    e_rows, n_ef = e_pad.shape

    (w1, b1), (w2, b2), (w3, b3), (w4, b4), (w5, b5), (w6, b6) = mlp_params
    w1s, w1d, w1e = w1[:n_nf], w1[n_nf:2 * n_nf], w1[2 * n_nf:]
    w6p = jnp.zeros((w6.shape[0], OUT_PAD), jnp.float32).at[:, :w6.shape[1]].set(w6)
    b6p = jnp.zeros((1, OUT_PAD), jnp.float32).at[:, :b6.shape[1]].set(b6)
    flat = [w1s, w1d, w1e, b1, w2, b2, w3, b3, w4, b4, w5, b5, w6p, b6p]

    const = lambda i: (0, 0)
    in_specs = [
        pl.BlockSpec((n_nodes, n_nf), const),             # x_n (resident)
        pl.BlockSpec((2, n_ef), const),                   # edge BN affine
        pl.BlockSpec((tile_e, n_ef), lambda i: (i, 0)),   # e (tiled)
        pl.BlockSpec((tile_e, 2), lambda i: (i, 0)),      # edge indices (tiled)
    ] + [pl.BlockSpec(p.shape, const) for p in flat]

    mlp_flops = (2 * n_nf * 64 + n_ef * 64 + 64 * 64 + 64 * 32
                 + 32 * 16 + 16 * 8 + 8 * OUT_PAD)
    gather_flops = 2 * n_nodes * n_nf
    param_bytes = sum(int(np.prod(p.shape)) for p in flat) * 4
    cost = pl.CostEstimate(
        flops=2 * e_rows * (mlp_flops + gather_flops),
        transcendentals=0,
        bytes_accessed=4 * (e_rows * (n_ef + 2 + OUT_PAD) + n_nodes * n_nf)
        + param_bytes,
    )

    return pl.pallas_call(
        _edge_kernel,
        grid=(e_rows // tile_e,),
        in_specs=in_specs,
        out_specs=pl.BlockSpec((tile_e, OUT_PAD), lambda i: (i, 0)),
        out_shape=jax.ShapeDtypeStruct((e_rows, OUT_PAD), jnp.float32),
        compiler_params=pltpu.CompilerParams(dimension_semantics=("parallel",)),
        cost_estimate=cost,
    )(x_n, e_aff, e_pad, idx_pad, *flat)


# ---------------------------------------------------------------------------
# Full forward pass
# ---------------------------------------------------------------------------
def full_edge_node_only_forward(x, edge_index, e, xbatch, params,
                                tile_e=DEFAULT_TILE_E):
    del xbatch  # unused by the edge-only model (matches PyTorch module)
    n_edges = e.shape[0]
    tile_e = min(tile_e, _round_up(max(n_edges, 1), 128))
    e_rows = _round_up(n_edges, tile_e)

    # Zero-pad edges/indices to a tile multiple (safe for batch statistics).
    e_pad = jnp.pad(e.astype(jnp.float32), ((0, e_rows - n_edges), (0, 0)))
    idx_pad = jnp.pad(edge_index.T.astype(jnp.int32),
                      ((0, e_rows - n_edges), (0, 0)))

    x_n, e_aff = prep_bn(x.astype(jnp.float32), e_pad, n_edges,
                         params['bn_node_gamma'], params['bn_node_beta'],
                         params['bn_edge_gamma'], params['bn_edge_beta'],
                         tile_e)
    out_pad = edge_pred_mlp(x_n, e_aff, e_pad, idx_pad, params['mlp'], tile_e)
    return {'edge_pred': [out_pad[:n_edges, :2]]}


# ---------------------------------------------------------------------------
# Parameter init (deterministic, PyTorch-Linear-style uniform bounds)
# ---------------------------------------------------------------------------
def init_linear(key, fan_in, fan_out):
    kw, kb = jax.random.split(key)
    bound = 1.0 / np.sqrt(fan_in)
    w = jax.random.uniform(kw, (fan_in, fan_out), jnp.float32, -bound, bound)
    b = jax.random.uniform(kb, (1, fan_out), jnp.float32, -bound, bound)
    return w, b


def init_params(key, n_nf, n_ef):
    dims = [n_nf * 2 + n_ef, 64, 64, 32, 16, 8, 2]
    keys = jax.random.split(key, len(dims) - 1)
    mlp = [init_linear(k, dims[i], dims[i + 1]) for i, k in enumerate(keys)]
    return {
        'bn_node_gamma': jnp.ones((n_nf,), jnp.float32),
        'bn_node_beta': jnp.zeros((n_nf,), jnp.float32),
        'bn_edge_gamma': jnp.ones((n_ef,), jnp.float32),
        'bn_edge_beta': jnp.zeros((n_ef,), jnp.float32),
        'mlp': mlp,
    }


# ---------------------------------------------------------------------------
# Pure-JAX reference for correctness checking
# ---------------------------------------------------------------------------
def reference_forward(x, edge_index, e, params):
    def bn(v, g, b):
        m = v.mean(0, keepdims=True)
        var = ((v - m) ** 2).mean(0, keepdims=True)
        return (v - m) / jnp.sqrt(var + BN_EPS) * g + b

    e_n = bn(e, params['bn_edge_gamma'], params['bn_edge_beta'])
    x_n = bn(x, params['bn_node_gamma'], params['bn_node_beta'])
    h = jnp.concatenate([x_n[edge_index[0]], x_n[edge_index[1]], e_n], axis=1)
    for i, (w, b) in enumerate(params['mlp']):
        h = h @ w + b
        if i < len(params['mlp']) - 1:
            h = jnp.where(h > 0, h, LEAK * h)
    return h


if __name__ == "__main__":
    # Config consistent with the module: n_node_features=16, n_edge_features=16
    n_nf, n_ef = 16, 16
    n_nodes, n_edges = 24, 640   # 640 edges -> tile_e=512, 2 grid steps + padding

    key = jax.random.PRNGKey(0)
    kx, ke, kidx, kp = jax.random.split(key, 4)

    x = jax.random.normal(kx, (n_nodes, n_nf), jnp.float32)
    e = jax.random.normal(ke, (n_edges, n_ef), jnp.float32)
    edge_index = jax.random.randint(kidx, (2, n_edges), 0, n_nodes, jnp.int32)
    xbatch = jnp.zeros((n_nodes,), jnp.int32)

    params = init_params(kp, n_nf, n_ef)

    out = full_edge_node_only_forward(x, edge_index, e, xbatch, params)
    edge_pred = jax.block_until_ready(out['edge_pred'][0])

    ref = jax.block_until_ready(reference_forward(x, edge_index, e, params))
    assert edge_pred.shape == (n_edges, 2)
    np.testing.assert_allclose(np.asarray(edge_pred), np.asarray(ref),
                               rtol=1e-4, atol=1e-4)

    print("KERNEL_OK")
</pallas_src>

<mosaic_0001>
module attributes {stable_mosaic.version = 11 : i64} {
  func.func @_prep_kernel(%arg0: i32, %arg1: memref<24x16xf32, #tpu.memory_space<vmem>>, %arg2: memref<512x16xf32, #tpu.memory_space<vmem>>, %arg3: memref<1x16xf32, #tpu.memory_space<vmem>>, %arg4: memref<1x16xf32, #tpu.memory_space<vmem>>, %arg5: memref<1x16xf32, #tpu.memory_space<vmem>>, %arg6: memref<1x16xf32, #tpu.memory_space<vmem>>, %arg7: memref<24x16xf32, #tpu.memory_space<vmem>>, %arg8: memref<2x16xf32, #tpu.memory_space<vmem>>, %arg9: memref<2x16xf32, #tpu.memory_space<vmem>>) attributes {dimension_semantics = [#tpu.dimension_semantics<arbitrary>], iteration_bounds = array<i64: 2>, scalar_prefetch = 0 : i64, scratch_operands = 1 : i64, tpu.core_type = #tpu.core_type<tc>, window_params = [{pipeline_mode = #tpu.pipeline_mode<synchronous>, transform_indices = @transform_0, window_bounds = array<i64: 24, 16>}, {transform_indices = @transform_1, window_bounds = array<i64: 512, 16>}, {pipeline_mode = #tpu.pipeline_mode<synchronous>, transform_indices = @transform_2, window_bounds = array<i64: 1, 16>}, {pipeline_mode = #tpu.pipeline_mode<synchronous>, transform_indices = @transform_3, window_bounds = array<i64: 1, 16>}, {pipeline_mode = #tpu.pipeline_mode<synchronous>, transform_indices = @transform_4, window_bounds = array<i64: 1, 16>}, {pipeline_mode = #tpu.pipeline_mode<synchronous>, transform_indices = @transform_5, window_bounds = array<i64: 1, 16>}, {pipeline_mode = #tpu.pipeline_mode<synchronous>, transform_indices = @transform_6, window_bounds = array<i64: 24, 16>}, {pipeline_mode = #tpu.pipeline_mode<synchronous>, transform_indices = @transform_7, window_bounds = array<i64: 2, 16>}]} {
    %c0_i32 = arith.constant 0 : i32
    %0 = arith.cmpi eq, %arg0, %c0_i32 : i32
    %1 = arith.extui %0 : i1 to i32
    %c0_i32_0 = arith.constant 0 : i32
    %2 = arith.cmpi ne, %1, %c0_i32_0 : i32
    scf.if %2 {
      %c0_11 = arith.constant 0 : index
      %c0_12 = arith.constant 0 : index
      %18 = vector.load %arg1[%c0_11, %c0_12] : memref<24x16xf32, #tpu.memory_space<vmem>>, vector<24x16xf32>
      %cst_13 = arith.constant dense<0.000000e+00> : vector<16xf32>
      %19 = vector.multi_reduction <add>, %18, %cst_13 [0] : vector<24x16xf32> to vector<16xf32>
      %20 = vector.shape_cast %19 : vector<16xf32> to vector<1x16xf32>
      %cst_14 = arith.constant 2.400000e+01 : f32
      %21 = vector.broadcast %cst_14 : f32 to vector<1x16xf32>
      %22 = arith.divf %20, %21 : vector<1x16xf32>
      %23 = vector.broadcast %22 : vector<1x16xf32> to vector<24x16xf32>
      %24 = arith.subf %18, %23 : vector<24x16xf32>
      %25 = arith.mulf %24, %24 : vector<24x16xf32>
      %cst_15 = arith.constant dense<0.000000e+00> : vector<16xf32>
      %26 = vector.multi_reduction <add>, %25, %cst_15 [0] : vector<24x16xf32> to vector<16xf32>
      %27 = vector.shape_cast %26 : vector<16xf32> to vector<1x16xf32>
      %cst_16 = arith.constant 2.400000e+01 : f32
      %28 = vector.broadcast %cst_16 : f32 to vector<1x16xf32>
      %29 = arith.divf %27, %28 : vector<1x16xf32>
      %30 = vector.broadcast %22 : vector<1x16xf32> to vector<24x16xf32>
      %31 = arith.subf %18, %30 : vector<24x16xf32>
      %cst_17 = arith.constant 9.99999974E-6 : f32
      %32 = vector.broadcast %cst_17 : f32 to vector<1x16xf32>
      %33 = arith.addf %29, %32 : vector<1x16xf32>
      %34 = math.rsqrt %33 : vector<1x16xf32>
      %35 = vector.broadcast %34 : vector<1x16xf32> to vector<24x16xf32>
      %36 = arith.mulf %31, %35 : vector<24x16xf32>
      %c0_18 = arith.constant 0 : index
      %c0_19 = arith.constant 0 : index
      %37 = vector.load %arg3[%c0_18, %c0_19] : memref<1x16xf32, #tpu.memory_space<vmem>>, vector<1x16xf32>
      %38 = vector.broadcast %37 : vector<1x16xf32> to vector<24x16xf32>
      %39 = arith.mulf %36, %38 : vector<24x16xf32>
      %c0_20 = arith.constant 0 : index
      %c0_21 = arith.constant 0 : index
      %40 = vector.load %arg4[%c0_20, %c0_21] : memref<1x16xf32, #tpu.memory_space<vmem>>, vector<1x16xf32>
      %41 = vector.broadcast %40 : vector<1x16xf32> to vector<24x16xf32>
      %42 = arith.addf %39, %41 : vector<24x16xf32>
      %c0_22 = arith.constant 0 : index
      %c0_23 = arith.constant 0 : index
      %43 = vector.load %arg7[%c0_22, %c0_23] : memref<24x16xf32, #tpu.memory_space<vmem>>, vector<24x16xf32>
      tpu.vector_store %arg7[%c0_22, %c0_23], %42 {strides = array<i32>} : memref<24x16xf32, #tpu.memory_space<vmem>>, vector<24x16xf32>,
      %cst_24 = arith.constant 0.000000e+00 : f32
      %44 = vector.broadcast %cst_24 : f32 to vector<2x16xf32>
      %c0_25 = arith.constant 0 : index
      %c0_26 = arith.constant 0 : index
      %45 = vector.load %arg9[%c0_25, %c0_26] : memref<2x16xf32, #tpu.memory_space<vmem>>, vector<2x16xf32>
      tpu.vector_store %arg9[%c0_25, %c0_26], %44 {strides = array<i32>} : memref<2x16xf32, #tpu.memory_space<vmem>>, vector<2x16xf32>,
    } else {
    }
    %c0 = arith.constant 0 : index
    %c0_1 = arith.constant 0 : index
    %3 = vector.load %arg2[%c0, %c0_1] : memref<512x16xf32, #tpu.memory_space<vmem>>, vector<512x16xf32>
    %c0_2 = arith.constant 0 : index
    %c0_3 = arith.constant 0 : index
    %4 = vector.load %arg9[%c0_2, %c0_3] : memref<2x16xf32, #tpu.memory_space<vmem>>, vector<1x16xf32>
    %cst = arith.constant dense<0.000000e+00> : vector<16xf32>
    %5 = vector.multi_reduction <add>, %3, %cst [0] : vector<512x16xf32> to vector<16xf32>
    %6 = vector.shape_cast %5 : vector<16xf32> to vector<1x16xf32>
    %7 = arith.addf %4, %6 : vector<1x16xf32>
    %c0_4 = arith.constant 0 : index
    %c0_5 = arith.constant 0 : index
    %8 = vector.load %arg9[%c0_4, %c0_5] : memref<2x16xf32, #tpu.memory_space<vmem>>, vector<1x16xf32>
    tpu.vector_store %arg9[%c0_4, %c0_5], %7 {strides = array<i32>} : memref<2x16xf32, #tpu.memory_space<vmem>>, vector<1x16xf32>,
    %c1 = arith.constant 1 : index
    %c0_6 = arith.constant 0 : index
    %9 = vector.load %arg9[%c1, %c0_6] : memref<2x16xf32, #tpu.memory_space<vmem>>, vector<1x16xf32>
    %10 = arith.mulf %3, %3 : vector<512x16xf32>
    %cst_7 = arith.constant dense<0.000000e+00> : vector<16xf32>
    %11 = vector.multi_reduction <add>, %10, %cst_7 [0] : vector<512x16xf32> to vector<16xf32>
    %12 = vector.shape_cast %11 : vector<16xf32> to vector<1x16xf32>
    %13 = arith.addf %9, %12 : vector<1x16xf32>
    %c1_8 = arith.constant 1 : index
    %c0_9 = arith.constant 0 : index
    %14 = vector.load %arg9[%c1_8, %c0_9] : memref<2x16xf32, #tpu.memory_space<vmem>>, vector<1x16xf32>
    tpu.vector_store %arg9[%c1_8, %c0_9], %13 {strides = array<i32>} : memref<2x16xf32, #tpu.memory_space<vmem>>, vector<1x16xf32>,
    %c1_i32 = arith.constant 1 : i32
    %15 = arith.cmpi eq, %arg0, %c1_i32 : i32
    %16 = arith.extui %15 : i1 to i32
    %c0_i32_10 = arith.constant 0 : i32
    %17 = arith.cmpi ne, %16, %c0_i32_10 : i32
    scf.if %17 {
      %c0_11 = arith.constant 0 : index
      %c0_12 = arith.constant 0 : index
      %18 = vector.load %arg9[%c0_11, %c0_12] : memref<2x16xf32, #tpu.memory_space<vmem>>, vector<1x16xf32>
      %cst_13 = arith.constant 1.562500e-03 : f32
      %19 = vector.broadcast %cst_13 : f32 to vector<1x16xf32>
      %20 = arith.mulf %18, %19 : vector<1x16xf32>
      %c1_14 = arith.constant 1 : index
      %c0_15 = arith.constant 0 : index
      %21 = vector.load %arg9[%c1_14, %c0_15] : memref<2x16xf32, #tpu.memory_space<vmem>>, vector<1x16xf32>
      %cst_16 = arith.constant 1.562500e-03 : f32
      %22 = vector.broadcast %cst_16 : f32 to vector<1x16xf32>
      %23 = arith.mulf %21, %22 : vector<1x16xf32>
      %24 = arith.mulf %20, %20 : vector<1x16xf32>
      %25 = arith.subf %23, %24 : vector<1x16xf32>
      %c0_17 = arith.constant 0 : index
      %c0_18 = arith.constant 0 : index
      %26 = vector.load %arg5[%c0_17, %c0_18] : memref<1x16xf32, #tpu.memory_space<vmem>>, vector<1x16xf32>
      %cst_19 = arith.constant 9.99999974E-6 : f32
      %27 = vector.broadcast %cst_19 : f32 to vector<1x16xf32>
      %28 = arith.addf %25, %27 : vector<1x16xf32>
      %29 = math.rsqrt %28 : vector<1x16xf32>
      %30 = arith.mulf %26, %29 : vector<1x16xf32>
      %c0_20 = arith.constant 0 : index
      %c0_21 = arith.constant 0 : index
      %31 = vector.load %arg8[%c0_20, %c0_21] : memref<2x16xf32, #tpu.memory_space<vmem>>, vector<1x16xf32>
      tpu.vector_store %arg8[%c0_20, %c0_21], %30 {strides = array<i32>} : memref<2x16xf32, #tpu.memory_space<vmem>>, vector<1x16xf32>,
      %c0_22 = arith.constant 0 : index
      %c0_23 = arith.constant 0 : index
      %32 = vector.load %arg6[%c0_22, %c0_23] : memref<1x16xf32, #tpu.memory_space<vmem>>, vector<1x16xf32>
      %33 = arith.mulf %20, %30 : vector<1x16xf32>
      %34 = arith.subf %32, %33 : vector<1x16xf32>
      %c1_24 = arith.constant 1 : index
      %c0_25 = arith.constant 0 : index
      %35 = vector.load %arg8[%c1_24, %c0_25] : memref<2x16xf32, #tpu.memory_space<vmem>>, vector<1x16xf32>
      tpu.vector_store %arg8[%c1_24, %c0_25], %34 {strides = array<i32>} : memref<2x16xf32, #tpu.memory_space<vmem>>, vector<1x16xf32>,
    } else {
    }
    return
  }
  func.func @transform_0(%arg0: i32) -> (i32, i32) {
    %c0_i32 = arith.constant 0 : i32
    %c0_i32_0 = arith.constant 0 : i32
    %c0_i32_1 = arith.constant 0 : i32
    return %c0_i32, %c0_i32_0 : i32, i32
  }
  func.func @transform_1(%arg0: i32) -> (i32, i32) {
    %c0_i32 = arith.constant 0 : i32
    %c0_i32_0 = arith.constant 0 : i32
    return %arg0, %c0_i32 : i32, i32
  }
  func.func @transform_2(%arg0: i32) -> (i32, i32) {
    %c0_i32 = arith.constant 0 : i32
    %c0_i32_0 = arith.constant 0 : i32
    %c0_i32_1 = arith.constant 0 : i32
    return %c0_i32, %c0_i32_0 : i32, i32
  }
  func.func @transform_3(%arg0: i32) -> (i32, i32) {
    %c0_i32 = arith.constant 0 : i32
    %c0_i32_0 = arith.constant 0 : i32
    %c0_i32_1 = arith.constant 0 : i32
    return %c0_i32, %c0_i32_0 : i32, i32
  }
  func.func @transform_4(%arg0: i32) -> (i32, i32) {
    %c0_i32 = arith.constant 0 : i32
    %c0_i32_0 = arith.constant 0 : i32
    %c0_i32_1 = arith.constant 0 : i32
    return %c0_i32, %c0_i32_0 : i32, i32
  }
  func.func @transform_5(%arg0: i32) -> (i32, i32) {
    %c0_i32 = arith.constant 0 : i32
    %c0_i32_0 = arith.constant 0 : i32
    %c0_i32_1 = arith.constant 0 : i32
    return %c0_i32, %c0_i32_0 : i32, i32
  }
  func.func @transform_6(%arg0: i32) -> (i32, i32) {
    %c0_i32 = arith.constant 0 : i32
    %c0_i32_0 = arith.constant 0 : i32
    %c0_i32_1 = arith.constant 0 : i32
    return %c0_i32, %c0_i32_0 : i32, i32
  }
  func.func @transform_7(%arg0: i32) -> (i32, i32) {
    %c0_i32 = arith.constant 0 : i32
    %c0_i32_0 = arith.constant 0 : i32
    %c0_i32_1 = arith.constant 0 : i32
    return %c0_i32, %c0_i32_0 : i32, i32
  }
}

</mosaic_0001>

<bundles_post_ra>
// kernel: tpu_custom_call.1
= control target key start
LH: loop header
LB: loop body
LE: loop exit
PB: predicated region body
PF: predicated region fallthrough
CT: control target
= control target key end

     0   :  { %13 = vsyncpa [#allocation4], 0  ;;  %s921_s24 = smov 0   ;;  %s1490_s0 = inlined_call_operand.vmem [shape: f32[24,16], index: 0, kind: input, shape index: {}]   ;;  %s1491_s1 = inlined_call_operand.vmem [shape: f32[1024,16], index: 1, kind: input, shape index: {}]   ;;  %s1492_s2 = inlined_call_operand.vmem [shape: f32[1,16], index: 2, kind: input, shape index: {}]   ;;  %s1493_s3 = inlined_call_operand.vmem [shape: f32[1,16], index: 3, kind: input, shape index: {}]   ;;  %s1494_s4 = inlined_call_operand.vmem [shape: f32[1,16], index: 4, kind: input, shape index: {}]   ;;  %s1495_s5 = inlined_call_operand.vmem [shape: f32[1,16], index: 5, kind: input, shape index: {}]   ;;  %s1496_s6 = inlined_call_operand.vmem [shape: f32[24,16], index: 6, kind: output, shape index: {0}]   ;;  %s1497_s7 = inlined_call_operand.hbm [shape: f32[2,16], index: 7, kind: output, shape index: {1}]  }
   0x1 LB: > { %s927_s25 = sadd.s32 4294967295, %s877_s24   ;;  %p810_p0 = scmp.ge.s32.totalorder %s877_s24, 1  ;;  %s877_s24 = sphi %s921_s24, %s19_s24  }
   0x2   : > { %p232_p1 = scmp.lt.s32.totalorder %s877_s24, 3 }
   0x4   : > { %p233_p2 = pnand %p810_p0, %p232_p1 }
   0x5   : > { %s811_s26 = sshll.u32 (!%p233_p2), %s927_s25, 6  ;;  %p813_p4 = scmp.ne.s32.totalorder (!%p233_p2), %s927_s25, 0 }
   0x6   : > { %236 = sbr.rel (%p233_p2) target bundleno = 298 (0x12a), region = 44  ;;  %p260_p3 = scmp.lt.s32.totalorder (!%p233_p2), %s811_s26, 127 }
   0xd   : > { %s1499_s26 = smov (!%p260_p3, %s811_s26), 127  ;;  %268 = sbr.rel (%p813_p4) target bundleno = 78 (0x4e), region = 48 }
   0xe   : > { %s812_s27 = sshll.u32 %s1499_s26, 3  ;;  %v269_v0 = vld [vmem:[%s1490_s0] sm:$0xff] (!%p813_p4)  ;;  %v270_v1 = vld [vmem:[%s1490_s0 + $0x8] sm:$0xff] (!%p813_p4)  ;;  %v271_v2 = vld [vmem:[%s1490_s0 + $0x10] sm:$0xff] (!%p813_p4)  ;;  %vm272_vm0 = vcmask (!%p813_p4), 130048   ;;  %vm332_vm1 = vcmask (!%p813_p4), 123904  }
   0xf   : > { %s935_s30 = scalar_lea.vmem %s1491_s1, %s812_s27  ;;  %v273_v3 = vsel (!%p813_p4), %vm272_vm0, %v269_v0, 0.0  ;;  %v274_v4 = vsel (!%p813_p4), %vm272_vm0, %v270_v1, 0.0  ;;  %v276_v5 = vsel (!%p813_p4), %vm272_vm0, %v271_v2, 0.0  ;;  %v879_v6 = vmov (!%p813_p4), 0.0   ;;  %v814_v36 = vld [vmem:[%s1492_s2] ss:$0 sm:$0xff] (!%p813_p4) }
  0x10   : > { %333 = vst.msk [vmem:[#allocation2] sm:$0x3] (!%p813_p4), %vm332_vm1, %v879_v6  ;;  %v275_v7 = vadd.f32 (!%p813_p4), %v274_v4, %v273_v3  ;;  %v815_v40 = vld [vmem:[%s1493_s3] ss:$0 sm:$0xff] (!%p813_p4) }
  0x12   : > { %v277_v8 = vadd.f32 (!%p813_p4), %v276_v5, %v275_v7 }
  0x14   : > { %v278_v9 = vrot.slane %v277_v8, 4 }
  0x16   : > { %v279_v10 = vadd.f32 %v278_v9, %v277_v8 }
  0x18   : > { %v280_v11 = vrot.slane %v279_v10, 2 }
  0x1a   : > { %v281_v12 = vadd.f32 %v280_v11, %v279_v10 }
  0x1c   : > { %v282_v13 = vrot.slane %v281_v12, 1 }
  0x1e   : > { %v283_v14 = vadd.f32 %v282_v13, %v281_v12 }
  0x20   : > { %v285_v15 = vmul.f32 0.041666668, %v283_v14 }
  0x22   : > { %v286_v16 = vsub.f32 %v269_v0, %v285_v15  ;;  %v287_v17 = vsub.f32 %v270_v1, %v285_v15  ;;  %v288_v18 = vsub.f32 %v271_v2, %v285_v15 }
  0x24   : > { %v289_v19 = vmul.f32 %v286_v16, %v286_v16  ;;  %v290_v20 = vmul.f32 %v287_v17, %v287_v17  ;;  %v291_v21 = vmul.f32 %v288_v18, %v288_v18 }
  0x26   : > { %v292_v22 = vsel %vm272_vm0, %v289_v19, 0.0  ;;  %v293_v23 = vsel %vm272_vm0, %v290_v20, 0.0  ;;  %v295_v24 = vsel %vm272_vm0, %v291_v21, 0.0 }
  0x27   : > { %v294_v25 = vadd.f32 %v293_v23, %v292_v22 }
  0x29   : > { %v296_v26 = vadd.f32 %v295_v24, %v294_v25 }
  0x2b   : > { %v297_v27 = vrot.slane %v296_v26, 4 }
  0x2d   : > { %v298_v28 = vadd.f32 %v297_v27, %v296_v26 }
  0x2f   : > { %v299_v29 = vrot.slane %v298_v28, 2 }
  0x31   : > { %v300_v30 = vadd.f32 %v299_v29, %v298_v28 }
  0x33   : > { %v301_v31 = vrot.slane %v300_v30, 1 }
  0x35   : > { %v302_v32 = vadd.f32 %v301_v31, %v300_v30 }
  0x37   : > { %v303_v33 = vmul.f32 0.041666668, %v302_v32 }
  0x39   : > { %v304_v34 = vadd.f32 1e-05, %v303_v33 }
  0x3b   : > { %837 = vrsqrt.f32 %v304_v34 }
  0x45   : > { %v838_v35 = vpop.eup %837 }
  0x46   : > { %v306_v37 = vmul.f32 %v838_v35, %v286_v16  ;;  %v307_v38 = vmul.f32 %v838_v35, %v287_v17  ;;  %v308_v39 = vmul.f32 %v838_v35, %v288_v18 }
  0x48   : > { %v316_v41 = vmul.f32 %v814_v36, %v306_v37  ;;  %v317_v42 = vmul.f32 %v814_v36, %v307_v38  ;;  %v318_v43 = vmul.f32 %v814_v36, %v308_v39 }
  0x4a   : > { %v326_v44 = vadd.f32 %v815_v40, %v316_v41  ;;  %v327_v45 = vadd.f32 %v815_v40, %v317_v42  ;;  %v328_v46 = vadd.f32 %v815_v40, %v318_v43 }
  0x4c   : > { %329 = vst.msk [vmem:[%s1496_s6] sm:$0xff] %vm272_vm0, %v326_v44  ;;  %330 = vst.msk [vmem:[%s1496_s6 + $0x8] sm:$0xff] %vm272_vm0, %v327_v45 }
  0x4d   : > { %331 = vst.msk [vmem:[%s1496_s6 + $0x10] sm:$0xff] %vm272_vm0, %v328_v46 }
  0x4e PF: > { %v334_v47 = vld [vmem:[%s935_s30] sm:$0xff]  ;;  %v335_v48 = vld [vmem:[%s935_s30 + $0x8] sm:$0xff]  ;;  %v336_v49 = vld [vmem:[%s935_s30 + $0x10] sm:$0xff]  ;;  %vm399_vm2 = vcmask 130048   ;;  %vm534_vm3 = vcmask 122880   ;;  %p816_p5 = scmp.ne.s32.totalorder %s927_s25, 1 }
  0x4f   : > { %v400_v50 = vsel %vm399_vm2, %v334_v47, 0.0  ;;  %v401_v51 = vsel %vm399_vm2, %v335_v48, 0.0  ;;  %v403_v52 = vsel %vm399_vm2, %v336_v49, 0.0  ;;  %v337_v53 = vld [vmem:[%s935_s30 + $0x18] sm:$0xff]  ;;  %v338_v56 = vld [vmem:[%s935_s30 + $0x20] sm:$0xff]  ;;  %v339_v59 = vld [vmem:[%s935_s30 + $0x28] sm:$0xff]  ;;  %v537_v37 = vmul.f32 %v334_v47, %v334_v47 }
  0x50   : > { %v402_v54 = vadd.f32 %v401_v51, %v400_v50  ;;  %v405_v55 = vsel %vm399_vm2, %v337_v53, 0.0  ;;  %v407_v58 = vsel %vm399_vm2, %v338_v56, 0.0  ;;  %v409_v61 = vsel %vm399_vm2, %v339_v59, 0.0  ;;  %v984_v62 = vld [vmem:[%s935_s30 + $0x30] sm:$0xff]  ;;  %v989_v1 = vld [vmem:[%s935_s30 + $0x38] sm:$0xff]  ;;  %v994_v4 = vld [vmem:[%s935_s30 + $0x40] sm:$0xff] }
  0x51   : > { %v411_v0 = vsel %vm399_vm2, %v984_v62, 0.0  ;;  %v413_v3 = vsel %vm399_vm2, %v989_v1, 0.0  ;;  %v415_v6 = vsel %vm399_vm2, %v994_v4, 0.0  ;;  %v999_v7 = vld [vmem:[%s935_s30 + $0x48] sm:$0xff]  ;;  %v1004_v10 = vld [vmem:[%s935_s30 + $0x50] sm:$0xff]  ;;  %v1009_v13 = vld [vmem:[%s935_s30 + $0x58] sm:$0xff]  ;;  %v538_v40 = vmul.f32 %v335_v48, %v335_v48 }
  0x52   : > { %v404_v57 = vadd.f32 %v403_v52, %v402_v54  ;;  %v417_v9 = vsel %vm399_vm2, %v999_v7, 0.0  ;;  %v419_v12 = vsel %vm399_vm2, %v1004_v10, 0.0  ;;  %v421_v15 = vsel %vm399_vm2, %v1009_v13, 0.0  ;;  %v1014_v16 = vld [vmem:[%s935_s30 + $0x60] sm:$0xff]  ;;  %v1019_v19 = vld [vmem:[%s935_s30 + $0x68] sm:$0xff]  ;;  %v1024_v22 = vld [vmem:[%s935_s30 + $0x70] sm:$0xff] }
  0x53   : > { %v423_v18 = vsel %vm399_vm2, %v1014_v16, 0.0  ;;  %v425_v21 = vsel %vm399_vm2, %v1019_v19, 0.0  ;;  %v427_v24 = vsel %vm399_vm2, %v1024_v22, 0.0  ;;  %v1029_v25 = vld [vmem:[%s935_s30 + $0x78] sm:$0xff]  ;;  %v1034_v28 = vld [vmem:[%s935_s30 + $0x80] sm:$0xff]  ;;  %v1039_v31 = vld [vmem:[%s935_s30 + $0x88] sm:$0xff]  ;;  %v539_v41 = vmul.f32 %v336_v49, %v336_v49 }
  0x54   : > { %v406_v60 = vadd.f32 %v405_v55, %v404_v57  ;;  %v429_v27 = vsel %vm399_vm2, %v1029_v25, 0.0  ;;  %v431_v30 = vsel %vm399_vm2, %v1034_v28, 0.0  ;;  %v433_v33 = vsel %vm399_vm2, %v1039_v31, 0.0  ;;  %v1044_v34 = vld [vmem:[%s935_s30 + $0x90] sm:$0xff]  ;;  %v1049_v38 = vld [vmem:[%s935_s30 + $0x98] sm:$0xff]  ;;  %v1054_v43 = vld [vmem:[%s935_s30 + $0xa0] sm:$0xff] }
  0x55   : > { %v435_v36 = vsel %vm399_vm2, %v1044_v34, 0.0  ;;  %v437_v42 = vsel %vm399_vm2, %v1049_v38, 0.0  ;;  %v540_v45 = vmul.f32 %v337_v53, %v337_v53  ;;  %v439_v46 = vsel %vm399_vm2, %v1054_v43, 0.0  ;;  %v1060_v47 = vld [vmem:[%s935_s30 + $0xa8] sm:$0xff]  ;;  %v1067_v53 = vld [vmem:[%s935_s30 + $0xb0] sm:$0xff] }
  0x56   : > { %v408_v63 = vadd.f32 %v407_v58, %v406_v60  ;;  %v601_v50 = vsel %vm399_vm2, %v537_v37, 0.0  ;;  %v541_v52 = vmul.f32 %v338_v56, %v338_v56  ;;  %v602_v48 = vsel %vm399_vm2, %v538_v40, 0.0 }
  0x57   : > { %v604_v49 = vsel %vm399_vm2, %v539_v41, 0.0  ;;  %v441_v54 = vsel %vm399_vm2, %v1060_v47, 0.0  ;;  %v603_v55 = vadd.f32 %v602_v48, %v601_v50  ;;  %v542_v58 = vmul.f32 %v339_v59, %v339_v59 }
  0x58   : > { %v410_v2 = vadd.f32 %v409_v61, %v408_v63  ;;  %v606_v60 = vsel %vm399_vm2, %v540_v45, 0.0  ;;  %v443_v61 = vsel %vm399_vm2, %v1067_v53, 0.0  ;;  %v1073_v63 = vld [vmem:[%s935_s30 + $0xb8] sm:$0xff]  ;;  %v549_v45 = vmul.f32 %v1014_v16, %v1014_v16 }
  0x59   : > { %v605_v56 = vadd.f32 %v604_v49, %v603_v55  ;;  %v550_v48 = vmul.f32 %v1019_v19, %v1019_v19  ;;  %v1137_v55 = vld [vmem:[%s935_s30 + $0xf8] sm:$0xff] }
  0x5a   : > { %v412_v5 = vadd.f32 %v411_v0, %v410_v2  ;;  %v543_v2 = vmul.f32 %v984_v62, %v984_v62 }
  0x5b   : > { %v607_v59 = vadd.f32 %v606_v60, %v605_v56  ;;  %v624_v60 = vsel %vm399_vm2, %v549_v45, 0.0  ;;  %v1145_v56 = vld [vmem:[%s935_s30 + $0x100] sm:$0xff]  ;;  %v558_v45 = vmul.f32 %v1060_v47, %v1060_v47 }
  0x5c   : > { %v414_v8 = vadd.f32 %v413_v3, %v412_v5  ;;  %v608_v3 = vsel %vm399_vm2, %v541_v52, 0.0  ;;  %v445_v5 = vsel %vm399_vm2, %v1073_v63, 0.0 }
  0x5d   : > { %v609_v62 = vadd.f32 %v608_v3, %v607_v59  ;;  %v626_v3 = vsel %vm399_vm2, %v550_v48, 0.0  ;;  %v1153_v59 = vld [vmem:[%s935_s30 + $0x108] sm:$0xff]  ;;  %v559_v48 = vmul.f32 %v1067_v53, %v1067_v53 }
  0x5e   : > { %v416_v11 = vadd.f32 %v415_v6, %v414_v8  ;;  %v1081_v6 = vld [vmem:[%s935_s30 + $0xc0] sm:$0xff] }
  0x60   : > { %v418_v14 = vadd.f32 %v417_v9, %v416_v11  ;;  %v544_v9 = vmul.f32 %v989_v1, %v989_v1  ;;  %v610_v11 = vsel %vm399_vm2, %v542_v58, 0.0  ;;  %v551_v58 = vmul.f32 %v1024_v22, %v1024_v22 }
  0x61   : > { %v611_v1 = vadd.f32 %v610_v11, %v609_v62  ;;  %v1161_v62 = vld [vmem:[%s935_s30 + $0x110] sm:$0xff] }
  0x62   : > { %v420_v17 = vadd.f32 %v419_v12, %v418_v14  ;;  %v447_v12 = vsel %vm399_vm2, %v1081_v6, 0.0  ;;  %v1089_v14 = vld [vmem:[%s935_s30 + $0xc8] sm:$0xff]  ;;  %v628_v11 = vsel %vm399_vm2, %v551_v58, 0.0  ;;  %v560_v58 = vmul.f32 %v1073_v63, %v1073_v63 }
  0x64   : > { %v422_v20 = vadd.f32 %v421_v15, %v420_v17  ;;  %v545_v17 = vmul.f32 %v994_v4, %v994_v4 }
  0x66   : > { %v424_v23 = vadd.f32 %v423_v18, %v422_v20  ;;  %v612_v18 = vsel %vm399_vm2, %v543_v2, 0.0  ;;  %v449_v20 = vsel %vm399_vm2, %v1089_v14, 0.0  ;;  %v552_v2 = vmul.f32 %v1029_v25, %v1029_v25 }
  0x67   : > { %v613_v4 = vadd.f32 %v612_v18, %v611_v1  ;;  %v1169_v1 = vld [vmem:[%s935_s30 + $0x118] sm:$0xff] }
  0x68   : > { %v426_v26 = vadd.f32 %v425_v21, %v424_v23  ;;  %v1097_v21 = vld [vmem:[%s935_s30 + $0xd0] sm:$0xff]  ;;  %v630_v18 = vsel %vm399_vm2, %v552_v2, 0.0  ;;  %v561_v2 = vmul.f32 %v1081_v6, %v1081_v6 }
  0x6a   : > { %v428_v29 = vadd.f32 %v427_v24, %v426_v26  ;;  %v546_v24 = vmul.f32 %v999_v7, %v999_v7  ;;  %v614_v26 = vsel %vm399_vm2, %v544_v9, 0.0  ;;  %v553_v9 = vmul.f32 %v1034_v28, %v1034_v28 }
  0x6b   : > { %v615_v7 = vadd.f32 %v614_v26, %v613_v4  ;;  %v1177_v4 = vld [vmem:[%s935_s30 + $0x120] sm:$0xff] }
  0x6c   : > { %v430_v32 = vadd.f32 %v429_v27, %v428_v29  ;;  %v451_v27 = vsel %vm399_vm2, %v1097_v21, 0.0  ;;  %v1105_v29 = vld [vmem:[%s935_s30 + $0xd8] sm:$0xff]  ;;  %v618_v40 = vsel %vm399_vm2, %v546_v24, 0.0  ;;  %v555_v24 = vmul.f32 %v1044_v34, %v1044_v34 }
  0x6d   : > { %v632_v26 = vsel %vm399_vm2, %v553_v9, 0.0  ;;  %v562_v9 = vmul.f32 %v1089_v14, %v1089_v14 }
  0x6e   : > { %v432_v35 = vadd.f32 %v431_v30, %v430_v32  ;;  %v547_v32 = vmul.f32 %v1004_v10, %v1004_v10 }
  0x70   : > { %v434_v39 = vadd.f32 %v433_v33, %v432_v35  ;;  %v616_v33 = vsel %vm399_vm2, %v545_v17, 0.0  ;;  %v453_v35 = vsel %vm399_vm2, %v1105_v29, 0.0  ;;  %v554_v17 = vmul.f32 %v1039_v31, %v1039_v31 }
  0x71   : > { %v617_v10 = vadd.f32 %v616_v33, %v615_v7  ;;  %v1185_v7 = vld [vmem:[%s935_s30 + $0x128] sm:$0xff] }
  0x72   : > { %v436_v44 = vadd.f32 %v435_v36, %v434_v39  ;;  %v1113_v36 = vld [vmem:[%s935_s30 + $0xe0] sm:$0xff]  ;;  %v548_v39 = vmul.f32 %v1009_v13, %v1009_v13  ;;  %v634_v33 = vsel %vm399_vm2, %v554_v17, 0.0  ;;  %v563_v17 = vmul.f32 %v1097_v21, %v1097_v21 }
  0x73   : > { %v455_v41 = vsel %vm399_vm2, %v1113_v36, 0.0  ;;  %v619_v13 = vadd.f32 %v618_v40, %v617_v10  ;;  %v636_v40 = vsel %vm399_vm2, %v555_v24, 0.0  ;;  %v1193_v10 = vld [vmem:[%s935_s30 + $0x130] sm:$0xff]  ;;  %v564_v24 = vmul.f32 %v1105_v29, %v1105_v29 }
  0x74   : > { %v438_v51 = vadd.f32 %v437_v42, %v436_v44  ;;  %v1121_v42 = vld [vmem:[%s935_s30 + $0xe8] sm:$0xff]  ;;  %v622_v49 = vsel %vm399_vm2, %v548_v39, 0.0  ;;  %v557_v39 = vmul.f32 %v1054_v43, %v1054_v43 }
  0x75   : > { %v457_v50 = vsel %vm399_vm2, %v1121_v42, 0.0 }
  0x76   : > { %v440_v57 = vadd.f32 %v439_v46, %v438_v51  ;;  %v620_v46 = vsel %vm399_vm2, %v547_v32, 0.0  ;;  %v1129_v51 = vld [vmem:[%s935_s30 + $0xf0] sm:$0xff]  ;;  %v556_v32 = vmul.f32 %v1049_v38, %v1049_v38 }
  0x77   : > { %v621_v16 = vadd.f32 %v620_v46, %v619_v13  ;;  %v1201_v13 = vld [vmem:[%s935_s30 + $0x138] sm:$0xff] }
  0x78   : > { %v442_v0 = vadd.f32 %v441_v54, %v440_v57  ;;  %v459_v54 = vsel %vm399_vm2, %v1129_v51, 0.0  ;;  %v638_v46 = vsel %vm399_vm2, %v556_v32, 0.0  ;;  %v565_v32 = vmul.f32 %v1113_v36, %v1113_v36 }
  0x79   : > { %v623_v19 = vadd.f32 %v622_v49, %v621_v16  ;;  %v640_v49 = vsel %vm399_vm2, %v557_v39, 0.0  ;;  %v1209_v16 = vld [vmem:[%s935_s30 + $0x140] sm:$0xff]  ;;  %v566_v39 = vmul.f32 %v1121_v42, %v1121_v42 }
  0x7a   : > { %v444_v8 = vadd.f32 %v443_v61, %v442_v0  ;;  %v461_v61 = vsel %vm399_vm2, %v1137_v55, 0.0 }
  0x7b   : > { %v625_v22 = vadd.f32 %v624_v60, %v623_v19  ;;  %v642_v60 = vsel %vm399_vm2, %v558_v45, 0.0  ;;  %v1217_v19 = vld [vmem:[%s935_s30 + $0x148] sm:$0xff]  ;;  %v567_v45 = vmul.f32 %v1129_v51, %v1129_v51 }
  0x7c   : > { %v446_v15 = vadd.f32 %v445_v5, %v444_v8  ;;  %v463_v5 = vsel %vm399_vm2, %v1145_v56, 0.0 }
  0x7d   : > { %v627_v25 = vadd.f32 %v626_v3, %v625_v22  ;;  %v644_v3 = vsel %vm399_vm2, %v559_v48, 0.0  ;;  %v1225_v22 = vld [vmem:[%s935_s30 + $0x150] sm:$0xff]  ;;  %v568_v48 = vmul.f32 %v1137_v55, %v1137_v55 }
  0x7e   : > { %v448_v23 = vadd.f32 %v447_v12, %v446_v15  ;;  %v465_v12 = vsel %vm399_vm2, %v1153_v59, 0.0 }
  0x7f   : > { %v629_v28 = vadd.f32 %v628_v11, %v627_v25  ;;  %v646_v11 = vsel %vm399_vm2, %v560_v58, 0.0  ;;  %v1233_v25 = vld [vmem:[%s935_s30 + $0x158] sm:$0xff]  ;;  %v569_v58 = vmul.f32 %v1145_v56, %v1145_v56 }
  0x80   : > { %v450_v30 = vadd.f32 %v449_v20, %v448_v23  ;;  %v467_v20 = vsel %vm399_vm2, %v1161_v62, 0.0 }
  0x81   : > { %v631_v31 = vadd.f32 %v630_v18, %v629_v28  ;;  %v648_v18 = vsel %vm399_vm2, %v561_v2, 0.0  ;;  %v1241_v28 = vld [vmem:[%s935_s30 + $0x160] sm:$0xff]  ;;  %v570_v2 = vmul.f32 %v1153_v59, %v1153_v59 }
  0x82   : > { %v452_v37 = vadd.f32 %v451_v27, %v450_v30  ;;  %v469_v27 = vsel %vm399_vm2, %v1169_v1, 0.0 }
  0x83   : > { %v633_v34 = vadd.f32 %v632_v26, %v631_v31  ;;  %v650_v26 = vsel %vm399_vm2, %v562_v9, 0.0  ;;  %v1249_v31 = vld [vmem:[%s935_s30 + $0x168] sm:$0xff]  ;;  %v571_v9 = vmul.f32 %v1161_v62, %v1161_v62 }
  0x84   : > { %v454_v44 = vadd.f32 %v453_v35, %v452_v37  ;;  %v471_v35 = vsel %vm399_vm2, %v1177_v4, 0.0 }
  0x85   : > { %v635_v38 = vadd.f32 %v634_v33, %v633_v34  ;;  %v652_v33 = vsel %vm399_vm2, %v563_v17, 0.0  ;;  %v1257_v34 = vld [vmem:[%s935_s30 + $0x170] sm:$0xff]  ;;  %v572_v17 = vmul.f32 %v1169_v1, %v1169_v1 }
  0x86   : > { %v456_v52 = vadd.f32 %v455_v41, %v454_v44  ;;  %v473_v41 = vsel %vm399_vm2, %v1185_v7, 0.0 }
  0x87   : > { %v637_v43 = vadd.f32 %v636_v40, %v635_v38  ;;  %v654_v40 = vsel %vm399_vm2, %v564_v24, 0.0  ;;  %v1265_v38 = vld [vmem:[%s935_s30 + $0x178] sm:$0xff]  ;;  %v573_v24 = vmul.f32 %v1177_v4, %v1177_v4 }
  0x88   : > { %v458_v57 = vadd.f32 %v457_v50, %v456_v52  ;;  %v475_v50 = vsel %vm399_vm2, %v1193_v10, 0.0 }
  0x89   : > { %v639_v47 = vadd.f32 %v638_v46, %v637_v43  ;;  %v656_v46 = vsel %vm399_vm2, %v565_v32, 0.0  ;;  %v1273_v43 = vld [vmem:[%s935_s30 + $0x180] sm:$0xff]  ;;  %v574_v32 = vmul.f32 %v1185_v7, %v1185_v7 }
  0x8a   : > { %v460_v0 = vadd.f32 %v459_v54, %v458_v57  ;;  %v477_v54 = vsel %vm399_vm2, %v1201_v13, 0.0 }
  0x8b   : > { %v641_v53 = vadd.f32 %v640_v49, %v639_v47  ;;  %v658_v49 = vsel %vm399_vm2, %v566_v39, 0.0  ;;  %v1281_v47 = vld [vmem:[%s935_s30 + $0x188] sm:$0xff]  ;;  %v575_v39 = vmul.f32 %v1193_v10, %v1193_v10 }
  0x8c   : > { %v462_v8 = vadd.f32 %v461_v61, %v460_v0  ;;  %v479_v61 = vsel %vm399_vm2, %v1209_v16, 0.0 }
  0x8d   : > { %v643_v63 = vadd.f32 %v642_v60, %v641_v53  ;;  %v660_v60 = vsel %vm399_vm2, %v567_v45, 0.0  ;;  %v1289_v53 = vld [vmem:[%s935_s30 + $0x190] sm:$0xff]  ;;  %v576_v45 = vmul.f32 %v1201_v13, %v1201_v13 }
  0x8e   : > { %v464_v15 = vadd.f32 %v463_v5, %v462_v8  ;;  %v481_v5 = vsel %vm399_vm2, %v1217_v19, 0.0 }
  0x8f   : > { %v645_v6 = vadd.f32 %v644_v3, %v643_v63  ;;  %v662_v3 = vsel %vm399_vm2, %v568_v48, 0.0  ;;  %v1297_v63 = vld [vmem:[%s935_s30 + $0x198] sm:$0xff]  ;;  %v577_v48 = vmul.f32 %v1209_v16, %v1209_v16 }
  0x90   : > { %v466_v23 = vadd.f32 %v465_v12, %v464_v15  ;;  %v483_v12 = vsel %vm399_vm2, %v1225_v22, 0.0 }
  0x91   : > { %v647_v14 = vadd.f32 %v646_v11, %v645_v6  ;;  %v664_v11 = vsel %vm399_vm2, %v569_v58, 0.0  ;;  %v1305_v6 = vld [vmem:[%s935_s30 + $0x1a0] sm:$0xff]  ;;  %v578_v58 = vmul.f32 %v1217_v19, %v1217_v19 }
  0x92   : > { %v468_v30 = vadd.f32 %v467_v20, %v466_v23  ;;  %v485_v20 = vsel %vm399_vm2, %v1233_v25, 0.0 }
  0x93   : > { %v649_v21 = vadd.f32 %v648_v18, %v647_v14  ;;  %v666_v18 = vsel %vm399_vm2, %v570_v2, 0.0  ;;  %v1313_v14 = vld [vmem:[%s935_s30 + $0x1a8] sm:$0xff]  ;;  %v579_v2 = vmul.f32 %v1225_v22, %v1225_v22 }
  0x94   : > { %v470_v37 = vadd.f32 %v469_v27, %v468_v30  ;;  %v487_v27 = vsel %vm399_vm2, %v1241_v28, 0.0 }
  0x95   : > { %v651_v29 = vadd.f32 %v650_v26, %v649_v21  ;;  %v668_v26 = vsel %vm399_vm2, %v571_v9, 0.0  ;;  %v1321_v21 = vld [vmem:[%s935_s30 + $0x1b0] sm:$0xff]  ;;  %v580_v9 = vmul.f32 %v1233_v25, %v1233_v25 }
  0x96   : > { %v472_v44 = vadd.f32 %v471_v35, %v470_v37  ;;  %v489_v35 = vsel %vm399_vm2, %v1249_v31, 0.0  ;;  %v1385_v25 = vld [vmem:[%s935_s30 + $0x1f0] sm:$0xff] }
  0x97   : > { %v653_v36 = vadd.f32 %v652_v33, %v651_v29  ;;  %v670_v33 = vsel %vm399_vm2, %v572_v17, 0.0  ;;  %v1329_v29 = vld [vmem:[%s935_s30 + $0x1b8] sm:$0xff]  ;;  %v581_v17 = vmul.f32 %v1241_v28, %v1241_v28 }
  0x98   : > { %v474_v52 = vadd.f32 %v473_v41, %v472_v44  ;;  %v491_v41 = vsel %vm399_vm2, %v1257_v34, 0.0 }
  0x99   : > { %v655_v42 = vadd.f32 %v654_v40, %v653_v36  ;;  %v672_v40 = vsel %vm399_vm2, %v573_v24, 0.0  ;;  %v1337_v36 = vld [vmem:[%s935_s30 + $0x1c0] sm:$0xff]  ;;  %v582_v24 = vmul.f32 %v1249_v31, %v1249_v31  ;;  %v584_v31 = vmul.f32 %v1265_v38, %v1265_v38 }
  0x9a   : > { %v476_v57 = vadd.f32 %v475_v50, %v474_v52  ;;  %v493_v50 = vsel %vm399_vm2, %v1265_v38, 0.0  ;;  %v587_v38 = vmul.f32 %v1289_v53, %v1289_v53 }
  0x9b   : > { %v657_v51 = vadd.f32 %v656_v46, %v655_v42  ;;  %v674_v46 = vsel %vm399_vm2, %v574_v32, 0.0  ;;  %v1345_v42 = vld [vmem:[%s935_s30 + $0x1c8] sm:$0xff]  ;;  %v583_v32 = vmul.f32 %v1257_v34, %v1257_v34 }
  0x9c   : > { %v478_v0 = vadd.f32 %v477_v54, %v476_v57  ;;  %v495_v54 = vsel %vm399_vm2, %v1273_v43, 0.0 }
  0x9d   : > { %v659_v55 = vadd.f32 %v658_v49, %v657_v51  ;;  %v676_v49 = vsel %vm399_vm2, %v575_v39, 0.0  ;;  %v1353_v51 = vld [vmem:[%s935_s30 + $0x1d0] sm:$0xff]  ;;  %v690_v39 = vsel %vm399_vm2, %v582_v24, 0.0 }
  0x9e   : > { %v480_v8 = vadd.f32 %v479_v61, %v478_v0  ;;  %v497_v61 = vsel %vm399_vm2, %v1281_v47, 0.0 }
  0x9f   : > { %v661_v56 = vadd.f32 %v660_v60, %v659_v55  ;;  %v678_v60 = vsel %vm399_vm2, %v576_v45, 0.0  ;;  %v1361_v55 = vld [vmem:[%s935_s30 + $0x1d8] sm:$0xff] }
  0xa0   : > { %v482_v15 = vadd.f32 %v481_v5, %v480_v8  ;;  %v499_v5 = vsel %vm399_vm2, %v1289_v53, 0.0  ;;  %v590_v53 = vmul.f32 %v1313_v14, %v1313_v14 }
  0xa1   : > { %v663_v59 = vadd.f32 %v662_v3, %v661_v56  ;;  %v680_v3 = vsel %vm399_vm2, %v577_v48, 0.0  ;;  %v1369_v56 = vld [vmem:[%s935_s30 + $0x1e0] sm:$0xff] }
  0xa2   : > { %v484_v23 = vadd.f32 %v483_v12, %v482_v15  ;;  %v501_v12 = vsel %vm399_vm2, %v1297_v63, 0.0 }
  0xa3   : > { %v665_v62 = vadd.f32 %v664_v11, %v663_v59  ;;  %v682_v11 = vsel %vm399_vm2, %v578_v58, 0.0  ;;  %v1377_v59 = vld [vmem:[%s935_s30 + $0x1e8] sm:$0xff] }
  0xa4   : > { %v486_v30 = vadd.f32 %v485_v20, %v484_v23  ;;  %v503_v20 = vsel %vm399_vm2, %v1305_v6, 0.0 }
  0xa5   : > { %v667_v1 = vadd.f32 %v666_v18, %v665_v62  ;;  %v684_v18 = vsel %vm399_vm2, %v579_v2, 0.0  ;;  %v398_v2 = vld [vmem:[#allocation2] sm:$0x1] }
  0xa6   : > { %v488_v37 = vadd.f32 %v487_v27, %v486_v30  ;;  %v505_v27 = vsel %vm399_vm2, %v1313_v14, 0.0  ;;  %v593_v14 = vmul.f32 %v1337_v36, %v1337_v36 }
  0xa7   : > { %v669_v4 = vadd.f32 %v668_v26, %v667_v1  ;;  %v686_v26 = vsel %vm399_vm2, %v580_v9, 0.0  ;;  %v592_v9 = vmul.f32 %v1329_v29, %v1329_v29 }
  0xa8   : > { %v490_v44 = vadd.f32 %v489_v35, %v488_v37  ;;  %v507_v35 = vsel %vm399_vm2, %v1321_v21, 0.0 }
  0xa9   : > { %v671_v7 = vadd.f32 %v670_v33, %v669_v4  ;;  %v688_v33 = vsel %vm399_vm2, %v581_v17, 0.0  ;;  %v710_v17 = vsel %vm399_vm2, %v592_v9, 0.0 }
  0xaa   : > { %v492_v52 = vadd.f32 %v491_v41, %v490_v44  ;;  %v509_v41 = vsel %vm399_vm2, %v1329_v29, 0.0  ;;  %v595_v29 = vmul.f32 %v1353_v51, %v1353_v51 }
  0xab   : > { %v673_v10 = vadd.f32 %v672_v40, %v671_v7  ;;  %v585_v7 = vmul.f32 %v1273_v43, %v1273_v43  ;;  %v588_v43 = vmul.f32 %v1297_v63, %v1297_v63  ;;  %v591_v63 = vmul.f32 %v1321_v21, %v1321_v21 }
  0xac   : > { %v494_v57 = vadd.f32 %v493_v50, %v492_v52  ;;  %v511_v50 = vsel %vm399_vm2, %v1337_v36, 0.0  ;;  %v594_v21 = vmul.f32 %v1345_v42, %v1345_v42 }
  0xad   : > { %v675_v13 = vadd.f32 %v674_v46, %v673_v10  ;;  %v586_v46 = vmul.f32 %v1281_v47, %v1281_v47  ;;  %v696_v48 = vsel %vm399_vm2, %v585_v7, 0.0  ;;  %v589_v47 = vmul.f32 %v1305_v6, %v1305_v6 }
  0xae   : > { %v496_v0 = vadd.f32 %v495_v54, %v494_v57  ;;  %v513_v54 = vsel %vm399_vm2, %v1345_v42, 0.0  ;;  %v714_v36 = vsel %vm399_vm2, %v594_v21, 0.0  ;;  %v716_v42 = vsel %vm399_vm2, %v595_v29, 0.0 }
  0xaf   : > { %v677_v16 = vadd.f32 %v676_v49, %v675_v13  ;;  %v698_v13 = vsel %vm399_vm2, %v586_v46, 0.0 }
  0xb0   : > { %v498_v8 = vadd.f32 %v497_v61, %v496_v0  ;;  %v515_v61 = vsel %vm399_vm2, %v1353_v51, 0.0 }
  0xb1   : > { %v679_v19 = vadd.f32 %v678_v60, %v677_v16  ;;  %v700_v60 = vsel %vm399_vm2, %v587_v38, 0.0 }
  0xb2   : > { %v500_v15 = vadd.f32 %v499_v5, %v498_v8  ;;  %v517_v5 = vsel %vm399_vm2, %v1361_v55, 0.0 }
  0xb3   : > { %v681_v22 = vadd.f32 %v680_v3, %v679_v19  ;;  %v704_v19 = vsel %vm399_vm2, %v589_v47, 0.0 }
  0xb4   : > { %v502_v23 = vadd.f32 %v501_v12, %v500_v15  ;;  %v519_v12 = vsel %vm399_vm2, %v1369_v56, 0.0 }
  0xb5   : > { %v683_v62 = vadd.f32 %v682_v11, %v681_v22  ;;  %v706_v11 = vsel %vm399_vm2, %v590_v53, 0.0  ;;  %v708_v22 = vsel %vm399_vm2, %v591_v63, 0.0 }
  0xb6   : > { %v504_v30 = vadd.f32 %v503_v20, %v502_v23  ;;  %v521_v20 = vsel %vm399_vm2, %v1377_v59, 0.0 }
  0xb7   : > { %v685_v1 = vadd.f32 %v684_v18, %v683_v62 }
  0xb8   : > { %v506_v37 = vadd.f32 %v505_v27, %v504_v30  ;;  %v523_v27 = vsel %vm399_vm2, %v1385_v25, 0.0  ;;  %v1393_v30 = vld [vmem:[%s935_s30 + $0x1f8] sm:$0xff] }
  0xb9   : > { %v687_v4 = vadd.f32 %v686_v26, %v685_v1  ;;  %v597_v26 = vmul.f32 %v1369_v56, %v1369_v56  ;;  %v598_v1 = vmul.f32 %v1377_v59, %v1377_v59 }
  0xba   : > { %v508_v44 = vadd.f32 %v507_v35, %v506_v37  ;;  %v525_v35 = vsel %vm399_vm2, %v1393_v30, 0.0 }
  0xbb   : > { %v689_v40 = vadd.f32 %v688_v33, %v687_v4  ;;  %v722_v56 = vsel %vm399_vm2, %v598_v1, 0.0 }
  0xbc   : > { %v510_v52 = vadd.f32 %v509_v41, %v508_v44  ;;  %v692_v44 = vsel %vm399_vm2, %v583_v32, 0.0  ;;  %v599_v32 = vmul.f32 %v1385_v25, %v1385_v25 }
  0xbd   : > { %v691_v34 = vadd.f32 %v690_v39, %v689_v40 }
  0xbe   : > { %v512_v57 = vadd.f32 %v511_v50, %v510_v52  ;;  %v694_v50 = vsel %vm399_vm2, %v584_v31, 0.0 }
  0xbf   : > { %v693_v10 = vadd.f32 %v692_v44, %v691_v34 }
  0xc0   : > { %v514_v0 = vadd.f32 %v513_v54, %v512_v57 }
  0xc1   : > { %v695_v49 = vadd.f32 %v694_v50, %v693_v10 }
  0xc2   : > { %v516_v8 = vadd.f32 %v515_v61, %v514_v0  ;;  %v702_v0 = vsel %vm399_vm2, %v588_v43, 0.0  ;;  %v746_v43 = vld [vmem:[%s1494_s4] sm:$0x1] (!%p816_p5) }
  0xc3   : > { %v697_v57 = vadd.f32 %v696_v48, %v695_v49 }
  0xc4   : > { %v518_v15 = vadd.f32 %v517_v5, %v516_v8 }
  0xc5   : > { %v699_v61 = vadd.f32 %v698_v13, %v697_v57 }
  0xc6   : > { %v520_v23 = vadd.f32 %v519_v12, %v518_v15 }
  0xc7   : > { %v701_v3 = vadd.f32 %v700_v60, %v699_v61 }
  0xc8   : > { %v522_v28 = vadd.f32 %v521_v20, %v520_v23  ;;  %v712_v20 = vsel %vm399_vm2, %v593_v14, 0.0  ;;  %v596_v23 = vmul.f32 %v1361_v55, %v1361_v55  ;;  %v720_v55 = vsel %vm399_vm2, %v597_v26, 0.0 }
  0xc9   : > { %v703_v8 = vadd.f32 %v702_v0, %v701_v3 }
  0xca   : > { %v524_v37 = vadd.f32 %v523_v27, %v522_v28  ;;  %v718_v51 = vsel %vm399_vm2, %v596_v23, 0.0 }
  0xcb   : > { %v705_v12 = vadd.f32 %v704_v19, %v703_v8 }
  0xcc   : > { %v526_v41 = vadd.f32 %v525_v35, %v524_v37  ;;  %v600_v35 = vmul.f32 %v1393_v30, %v1393_v30  ;;  %v724_v37 = vsel %vm399_vm2, %v599_v32, 0.0 }
  0xcd   : > { %v707_v15 = vadd.f32 %v706_v11, %v705_v12 }
  0xce   : > { %v527_v45 = vrot.slane %v526_v41, 4  ;;  %v726_v59 = vsel %vm399_vm2, %v600_v35, 0.0 }
  0xcf   : > { %v709_v18 = vadd.f32 %v708_v22, %v707_v15 }
  0xd0   : > { %v528_v52 = vadd.f32 %v527_v45, %v526_v41  ;;  %v536_v45 = vld [vmem:[#allocation2 + $0x1] sm:$0x1] }
  0xd1   : > { %v711_v62 = vadd.f32 %v710_v17, %v709_v18 }
  0xd2   : > { %v529_v54 = vrot.slane %v528_v52, 2 }
  0xd3   : > { %v713_v24 = vadd.f32 %v712_v20, %v711_v62 }
  0xd4   : > { %v530_v58 = vadd.f32 %v529_v54, %v528_v52 }
  0xd5   : > { %v715_v27 = vadd.f32 %v714_v36, %v713_v24 }
  0xd6   : > { %v531_v16 = vrot.slane %v530_v58, 1 }
  0xd7   : > { %v717_v28 = vadd.f32 %v716_v42, %v715_v27 }
  0xd8   : > { %v532_v5 = vadd.f32 %v531_v16, %v530_v58  ;;  %v751_v58 = vld [vmem:[%s1495_s5] sm:$0x1] (!%p816_p5) }
  0xd9   : > { %v719_v33 = vadd.f32 %v718_v51, %v717_v28 }
  0xda   : > { %v533_v6 = vadd.f32 %v532_v5, %v398_v2 }
  0xdb   : > { %v721_v4 = vadd.f32 %v720_v55, %v719_v33 }
  0xdc   : > { %535 = vst.msk [vmem:[#allocation2] sm:$0x1] %vm534_vm3, %v533_v6 }
  0xdd   : > { %v723_v31 = vadd.f32 %v722_v56, %v721_v4 }
  0xdf   : > { %v725_v39 = vadd.f32 %v724_v37, %v723_v31 }
  0xe1   : > { %v727_v40 = vadd.f32 %v726_v59, %v725_v39 }
  0xe3   : > { %v728_v41 = vrot.slane %v727_v40, 4  ;;  %v740_v30 = vld [vmem:[#allocation2] sm:$0x1] (!%p816_p5) }
  0xe4   : > { %v741_v52 = vmul.f32 (!%p816_p5), 0.0015625, %v740_v30 }
  0xe5   : > { %v729_v7 = vadd.f32 %v728_v41, %v727_v40 }
  0xe6   : > { %v744_v48 = vmul.f32 (!%p816_p5), %v741_v52, %v741_v52 }
  0xe7   : > { %v730_v44 = vrot.slane %v729_v7, 2 }
  0xe9   : > { %v731_v25 = vadd.f32 %v730_v44, %v729_v7 }
  0xeb   : > { %v732_v34 = vrot.slane %v731_v25, 1  ;;  %739 = sbr.rel (%p816_p5) target bundleno = 273 (0x111), region = 52 }
  0xed   : > { %v733_v46 = vadd.f32 %v732_v34, %v731_v25 }
  0xef   : > { %v734_v50 = vadd.f32 %v733_v46, %v536_v45 }
  0xf1   : > { %735 = vst.msk [vmem:[#allocation2 + $0x1] sm:$0x1] %vm534_vm3, %v734_v50 }
  0xf8   : > { %v742_v10 = vld [vmem:[#allocation2 + $0x1] sm:$0x1] }
  0xf9   : > { %v743_v38 = vmul.f32 0.0015625, %v742_v10 }
  0xfb   : > { %v745_v49 = vsub.f32 %v743_v38, %v744_v48 }
  0xfd   : > { %v747_v54 = vadd.f32 1e-05, %v745_v49 }
  0xff   : > { %839 = vrsqrt.f32 %v747_v54 }
 0x109   : > { %v840_v13 = vpop.eup %839 }
 0x10a   : > { %v749_v57 = vmul.f32 %v840_v13, %v746_v43 }
 0x10c   : > { %750 = vst.msk [vmem:[#allocation3] sm:$0x1] %vm534_vm3, %v749_v57  ;;  %v752_v47 = vmul.f32 %v749_v57, %v741_v52 }
 0x10e   : > { %v753_v60 = vsub.f32 %v751_v58, %v752_v47 }
 0x110   : > { %754 = vst.msk [vmem:[#allocation3 + $0x1] sm:$0x1] %vm534_vm3, %v753_v60 }
 0x111 PF: > { %p825_p6 = scmp.eq.s32.totalorder %s927_s25, 1  ;;  %s880_s30 = smov [#allocation3]  }
 0x112   : > { %s765_s8 = sshll.u32 %s880_s30, 4  ;;  %s766_s8 = int_to_ptr.vmem [resolvable:$true] %s765_s8 }
 0x113   : > { %s841_s9 = scalar_lea.vmem %s766_s8, 32  ;;  %p848_p10 = scmp.lt.s32.totalorder %s766_s8, %s766_s8 }
 0x114   : > { %p842_p7 = scmp.ne.s32.totalorder %s766_s8, %s841_s9  ;;  %p849_p11 = scmp.lt.s32.totalorder %s841_s9, %s841_s9 }
 0x116   : > { %p843_p8 = pnand %p842_p7, %p825_p6  ;;  %p850_p12 = por %p849_p11, %p848_p10 }
 0x118   : > { %p844_p9 = pneg %p843_p8 }
 0x11a   : > { %p851_p13 = pnand %p850_p12, %p844_p9 }
 0x11c   : > { %854 = shalt.err (!%p851_p13)
}
 0x11d   : > { %s855_s12 = scalar_lea.hbm %s1497_s7, 32 }
 0x11e   : > { %p856_p0 = scmp.ne.s32.totalorder %s1497_s7, %s855_s12  ;;  %p861_p3 = scmp.lt.u32.totalorder %s855_s12, %s1497_s7 }
 0x120   : > { %p857_p1 = pnand %p856_p0, %p825_p6 }
 0x122   : > { %p858_p2 = pneg %p857_p1 }
 0x124   : > { %p863_p4 = pnand %p861_p3, %p858_p2 }
 0x126   : > { %866 = shalt.err (!%p863_p4)
}
 0x127   : > { %822 = dma.vmem_to_hbm [thread:$0]  (%p825_p6), %s766_s8, 32, %s1497_s7, [#allocation4]  }
 0x128   : > { %872 = dma.done.wait (%p825_p6), [#allocation4], 32  }
 0x129   : > { %874 = vsyncadd (%p825_p6), [#allocation4], 4294967264 }
 0x12a PF: > { %s19_s24 = sadd.s32 1, %s877_s24  }
 0x12b   : > { %p16_p5 = scmp.ge.s32.totalorder %s19_s24, 4  }
 0x12d   :  { %18 = sbr.rel (!%p16_p5) target bundleno = 1 (0x1), region = 87 }
 0x134   :  { %781 = vsyncpa [#allocation4], 1 }
 0x135   :  { %783 = vsyncpa [#allocation4 + $0x1], 1 }

</bundles_post_ra>
